<compile_context>
chip_gen: v7x
topology: tpu7x:2x2x1
jax: 0.10.0
libtpu: 0.0.40
codegen_flags: <defaults>
</compile_context>

<pallas_src>
import functools

import jax
import jax.numpy as jnp
from jax import lax
from jax.experimental import pallas as pl
from jax.experimental.pallas import tpu as pltpu


def _round_up(x, m):
    return (x + m - 1) // m * m


def _pick_batch_block(B, T_pad, E, CL, budget_bytes=4 << 20, min_steps=4):
    """Pick BB (multiple of 8 dividing B, else B) for pipelining + VMEM budget."""
    per_batch = T_pad * (E + CL) * 2  # bf16 streaming bytes per batch row
    cands = [d for d in range(8, B, 8) if B % d == 0]
    good = [d for d in cands if d * per_batch <= budget_bytes and B // d >= min_steps]
    if good:
        return max(good)
    ok = [d for d in cands if d * per_batch <= budget_bytes]
    if ok:
        return max(ok)
    return min(cands) if cands else B


def _attention_kernel(q_ref, enc_ref, loc_ref, pwc_ref, mask_ref,
                      wk_ref, wcl_ref, wv_ref,
                      ctx_ref, attw_ref, newcum_ref, *, bb, t):
    f32 = jnp.float32
    enc = enc_ref[...]                                       # (BB, T, E) bf16
    enc2d = enc.reshape(bb * t, enc.shape[-1])               # free retile (T % 8 == 0)

    # Fused projections on the MXU, f32 accumulation.
    keys = jnp.dot(enc2d, wk_ref[...], preferred_element_type=f32)      # (BB*T, A)
    loc = jnp.dot(loc_ref[...], wcl_ref[...], preferred_element_type=f32)  # (BB*T, A)
    a_dim = keys.shape[-1]
    hidden = (keys + loc).reshape(bb, t, a_dim) + q_ref[...][:, None, :]  # (BB, T, A)
    act = jnp.tanh(hidden)                                   # EUP, f32 (v5e-safe)

    # energies: VPU multiply + lane reduction against the (1, A) value row.
    energies = jnp.sum(act * wv_ref[...][None, :, :], axis=-1)           # (BB, T)
    energies = jnp.where(mask_ref[...] > 0.0, -jnp.inf, energies)

    # Softmax over time (lane axis), f32.
    m = jnp.max(energies, axis=-1, keepdims=True)
    p = jnp.exp(energies - m)
    w = p / jnp.sum(p, axis=-1, keepdims=True)               # (BB, T)

    # Context as a batched MXU contraction: (BB,1,T) @ (BB,T,E) -> (BB,1,E).
    ctx3 = jnp.einsum('bqt,bte->bqe', w[:, None, :].astype(enc.dtype), enc,
                      preferred_element_type=f32)
    ctx_ref[...] = ctx3[:, 0, :].astype(ctx_ref.dtype)

    attw_ref[...] = w.astype(attw_ref.dtype)
    newcum_ref[...] = (pwc_ref[...] + w).astype(newcum_ref.dtype)


def location_sensitive_attention(decoder_hidden, encoder_outputs,
                                 prev_weights, prev_weights_cum, mask,
                                 wq, wk, wconv, wloc, wv, *, batch_block=None):
    """Returns (context (B,E), attention_weights (B,T), new_prev_weights_cum (B,T))."""
    B, T, E = encoder_outputs.shape
    F_loc, _, K = wconv.shape
    A = wq.shape[0]
    pad = (K - 1) // 2
    f32, bf16 = jnp.float32, jnp.bfloat16

    # --- time padding (sublane-aligned reshape; padded frames masked to -inf) ---
    T_pad = _round_up(T, 8)
    pad_t = T_pad - T

    # --- weight folding (tiny, f32, once per call) ---
    # wc_flat[c*K + k, f] = wconv[f, c, k]
    wc_flat = jnp.transpose(wconv.astype(f32), (1, 2, 0)).reshape(2 * K, F_loc)
    wcl = jnp.dot(wc_flat, wloc.T.astype(f32),
                  precision=lax.Precision.HIGHEST)                       # (2K, A)
    CL = _round_up(2 * K, 8)
    wcl_b = jnp.pad(wcl, ((0, CL - 2 * K), (0, 0))).astype(bf16)          # (CL, A), pads = 0
    wk_b = wk.T.astype(bf16)                                              # (E, A)
    wv_row = wv.astype(f32)                                               # (1, A)

    # --- query projection (tiny GEMM, stays in the wrapper) ---
    q = jnp.dot(decoder_hidden.astype(f32), wq.T.astype(f32))             # (B, A)

    # --- im2col of the two location channels (zero-padded conv taps), bf16 ---
    pw_pad = jnp.pad(prev_weights.astype(f32), ((0, 0), (pad, pad)))
    pwc_pad = jnp.pad(prev_weights_cum.astype(f32), ((0, 0), (pad, pad)))
    idx = jnp.arange(T)[:, None] + jnp.arange(K)[None, :]                 # (T, K)
    loc_col = jnp.concatenate([pw_pad[:, idx], pwc_pad[:, idx]], axis=-1)  # (B, T, 2K)
    loc_col = jnp.pad(loc_col, ((0, 0), (0, pad_t), (0, CL - 2 * K)))
    loc_col = loc_col.astype(bf16).reshape(B * T_pad, CL)
    # TODO(synk): on v5e/v6e build these taps inside the kernel in VMEM (pltpu.roll on
    # the (B,T) rows) to avoid streaming the 2K-wide im2col slab through HBM.

    enc_b = encoder_outputs.astype(bf16)
    if pad_t:
        enc_b = jnp.pad(enc_b, ((0, 0), (0, pad_t), (0, 0)))

    maskf = jnp.zeros((B, T_pad), f32)
    if mask is not None:
        maskf = maskf.at[:, :T].set(mask.astype(f32))
    if pad_t:
        maskf = maskf.at[:, T:].set(1.0)                                   # mask padded frames

    pwc_in = jnp.pad(prev_weights_cum.astype(f32), ((0, 0), (0, pad_t)))   # (B, T_pad)

    # --- batch blocking for pipelining / megacore ---
    BB = batch_block if batch_block is not None else _pick_batch_block(B, T_pad, E, CL)
    assert B % BB == 0, "batch_block must divide batch size"
    grid = (B // BB,)

    # --- VMEM budget / cost hints ---
    block_in_bytes = BB * T_pad * (E + CL) * 2 + BB * (A + 3 * T_pad) * 4
    block_out_bytes = BB * (E + 2 * T_pad) * 4
    resident_bytes = (E + CL) * A * 2 + A * 4
    vmem_limit = int(min(64 << 20,
                         max(32 << 20, 2 * (block_in_bytes + block_out_bytes)
                             + resident_bytes + (2 << 20))))
    flops = 2 * B * T_pad * (E + CL) * A + 2 * B * T_pad * E + 3 * B * T_pad * A
    transcendentals = B * T_pad * (A + 1)
    bytes_accessed = (q.size * 4 + enc_b.size * 2 + loc_col.size * 2
                      + pwc_in.size * 4 + maskf.size * 4
                      + wk_b.size * 2 + wcl_b.size * 2 + wv_row.size * 4
                      + B * E * 4 + 2 * B * T_pad * 4)
    cost = pl.CostEstimate(flops=flops, transcendentals=transcendentals,
                           bytes_accessed=bytes_accessed)

    kernel = functools.partial(_attention_kernel, bb=BB, t=T_pad)

    grid_spec = pltpu.PrefetchScalarGridSpec(
        num_scalar_prefetch=0,
        grid=grid,
        in_specs=[
            pl.BlockSpec((BB, A), lambda i: (i, 0)),               # q (f32)
            pl.BlockSpec((BB, T_pad, E), lambda i: (i, 0, 0)),     # encoder (bf16)
            pl.BlockSpec((BB * T_pad, CL), lambda i: (i, 0)),      # im2col loc taps (bf16)
            pl.BlockSpec((BB, T_pad), lambda i: (i, 0)),           # prev_weights_cum (f32)
            pl.BlockSpec((BB, T_pad), lambda i: (i, 0)),           # mask (f32)
            pl.BlockSpec((E, A), lambda i: (0, 0)),                # key_proj.T (bf16)
            pl.BlockSpec((CL, A), lambda i: (0, 0)),               # folded conv+loc proj (bf16)
            pl.BlockSpec((1, A), lambda i: (0, 0)),                # value_proj row (f32)
        ],
        out_specs=[
            pl.BlockSpec((BB, E), lambda i: (i, 0)),               # context
            pl.BlockSpec((BB, T_pad), lambda i: (i, 0)),           # attention weights
            pl.BlockSpec((BB, T_pad), lambda i: (i, 0)),           # new prev_weights_cum
        ],
    )

    ctx, attw_p, newcum_p = pl.pallas_call(
        kernel,
        out_shape=(jax.ShapeDtypeStruct((B, E), f32),
                   jax.ShapeDtypeStruct((B, T_pad), f32),
                   jax.ShapeDtypeStruct((B, T_pad), f32)),
        grid_spec=grid_spec,
        compiler_params=pltpu.CompilerParams(
            dimension_semantics=("parallel",),
            vmem_limit_bytes=vmem_limit),
        cost_estimate=cost,
    )(q, enc_b, loc_col, pwc_in, maskf, wk_b, wcl_b, wv_row)

    return ctx, attw_p[:, :T], newcum_p[:, :T]


def _reference(decoder_hidden, encoder_outputs, prev_weights, prev_weights_cum,
               mask, wq, wk, wconv, wloc, wv):
    prec = lax.Precision.HIGHEST
    pad = (wconv.shape[-1] - 1) // 2
    q = jnp.dot(decoder_hidden, wq.T, precision=prec)                       # (B, A)
    keys = jnp.einsum("bte,ae->bta", encoder_outputs, wk, precision=prec)   # (B, T, A)
    locfeat = jnp.stack([prev_weights, prev_weights_cum], axis=1)           # (B, 2, T)
    proc = lax.conv_general_dilated(locfeat, wconv, (1,), [(pad, pad)],
                                    dimension_numbers=("NCH", "OIH", "NCH"),
                                    precision=prec)                         # (B, F, T)
    proc = jnp.einsum("bft,af->bta", proc, wloc, precision=prec)            # (B, T, A)
    e = jnp.einsum("bta,oa->bto", jnp.tanh(q[:, None, :] + keys + proc), wv,
                   precision=prec)[..., 0]                                  # (B, T)
    e = jnp.where(mask, -jnp.inf, e)
    w = jax.nn.softmax(e, axis=1)
    ctx = jnp.einsum("bt,bte->be", w, encoder_outputs, precision=prec)
    return ctx, w, prev_weights_cum + w


if __name__ == "__main__":
    B, T = 2, 8
    decoder_dim, encoder_dim = 32, 32
    attention_dim, attention_filters, kernel_size = 128, 32, 31

    key = jax.random.PRNGKey(0)
    ks = jax.random.split(key, 9)
    # Deterministic synthetic parameters (shapes per __init__; no checkpoint load).
    wq = jax.random.normal(ks[0], (attention_dim, decoder_dim), jnp.float32) * 0.1
    wk = jax.random.normal(ks[1], (attention_dim, encoder_dim), jnp.float32) * 0.1
    wconv = jax.random.normal(ks[2], (attention_filters, 2, kernel_size), jnp.float32) * 0.1
    wloc = jax.random.normal(ks[3], (attention_dim, attention_filters), jnp.float32) * 0.1
    wv = jax.random.normal(ks[4], (1, attention_dim), jnp.float32) * 0.1

    decoder_hidden = jax.random.normal(ks[5], (B, decoder_dim), jnp.float32)
    encoder_outputs = jax.random.normal(ks[6], (B, T, encoder_dim), jnp.float32)
    # Non-zero attention state so the location-conv path is exercised.
    prev_weights = jax.nn.softmax(jax.random.normal(ks[7], (B, T), jnp.float32), axis=-1)
    prev_weights_cum = prev_weights + jax.nn.softmax(
        jax.random.normal(ks[8], (B, T), jnp.float32), axis=-1)
    mask = jnp.zeros((B, T), dtype=bool).at[1, T - 2:].set(True)   # pad last 2 frames of batch 1

    ctx, attw, newcum = location_sensitive_attention(
        decoder_hidden, encoder_outputs, prev_weights, prev_weights_cum, mask,
        wq, wk, wconv, wloc, wv)
    jax.block_until_ready((ctx, attw, newcum))

    rctx, rattw, rnewcum = _reference(
        decoder_hidden, encoder_outputs, prev_weights, prev_weights_cum, mask,
        wq, wk, wconv, wloc, wv)

    # Kernel uses bf16 MXU operands with f32 accumulation; reference uses
    # Precision.HIGHEST, so allow a modest tolerance. Structural bugs (wrong
    # im2col / weight fold / masking / padding) would show up as O(0.1-1) errors.
    assert jnp.allclose(ctx, rctx, atol=2e-2, rtol=2e-2), "context mismatch"
    assert jnp.allclose(attw, rattw, atol=2e-2, rtol=2e-2), "attention weights mismatch"
    assert jnp.allclose(newcum, rnewcum, atol=2e-2, rtol=2e-2), "cumulative weights mismatch"
    print("KERNEL_OK")
</pallas_src>

<mosaic_0001>
module attributes {stable_mosaic.version = 11 : i64} {
  func.func @_attention_kernel(%arg0: i32, %arg1: memref<2x128xf32, #tpu.memory_space<vmem>>, %arg2: memref<2x8x32xbf16, #tpu.memory_space<vmem>>, %arg3: memref<16x64xbf16, #tpu.memory_space<vmem>>, %arg4: memref<2x8xf32, #tpu.memory_space<vmem>>, %arg5: memref<2x8xf32, #tpu.memory_space<vmem>>, %arg6: memref<32x128xbf16, #tpu.memory_space<vmem>>, %arg7: memref<64x128xbf16, #tpu.memory_space<vmem>>, %arg8: memref<1x128xf32, #tpu.memory_space<vmem>>, %arg9: memref<2x32xf32, #tpu.memory_space<vmem>>, %arg10: memref<2x8xf32, #tpu.memory_space<vmem>>, %arg11: memref<2x8xf32, #tpu.memory_space<vmem>>) attributes {dimension_semantics = [#tpu.dimension_semantics<parallel>], iteration_bounds = array<i64: 1>, scalar_prefetch = 0 : i64, scratch_operands = 0 : i64, tpu.core_type = #tpu.core_type<tc>, window_params = [{transform_indices = @transform_0, window_bounds = array<i64: 2, 128>}, {transform_indices = @transform_1, window_bounds = array<i64: 2, 8, 32>}, {transform_indices = @transform_2, window_bounds = array<i64: 16, 64>}, {transform_indices = @transform_3, window_bounds = array<i64: 2, 8>}, {transform_indices = @transform_4, window_bounds = array<i64: 2, 8>}, {pipeline_mode = #tpu.pipeline_mode<synchronous>, transform_indices = @transform_5, window_bounds = array<i64: 32, 128>}, {pipeline_mode = #tpu.pipeline_mode<synchronous>, transform_indices = @transform_6, window_bounds = array<i64: 64, 128>}, {pipeline_mode = #tpu.pipeline_mode<synchronous>, transform_indices = @transform_7, window_bounds = array<i64: 1, 128>}, {transform_indices = @transform_8, window_bounds = array<i64: 2, 32>}, {transform_indices = @transform_9, window_bounds = array<i64: 2, 8>}, {transform_indices = @transform_10, window_bounds = array<i64: 2, 8>}]} {
    %c0 = arith.constant 0 : index
    %c0_0 = arith.constant 0 : index
    %c0_1 = arith.constant 0 : index
    %0 = vector.load %arg2[%c0, %c0_0, %c0_1] : memref<2x8x32xbf16, #tpu.memory_space<vmem>>, vector<2x8x32xbf16>
    %1 = vector.shape_cast %0 : vector<2x8x32xbf16> to vector<16x32xbf16>
    %c0_2 = arith.constant 0 : index
    %c0_3 = arith.constant 0 : index
    %2 = vector.load %arg6[%c0_2, %c0_3] : memref<32x128xbf16, #tpu.memory_space<vmem>>, vector<32x128xbf16>
    %cst = arith.constant dense<0.000000e+00> : vector<16x128xf32>
    %3 = tpu.matmul %1, %2, %cst {dimension_numbers = #tpu.dot_dimension_numbers<[1], [0], [0], [1], [0, 0, 1, 1], [], []>} : vector<16x32xbf16>, vector<32x128xbf16>, vector<16x128xf32> -> vector<16x128xf32>
    %c0_4 = arith.constant 0 : index
    %c0_5 = arith.constant 0 : index
    %4 = vector.load %arg3[%c0_4, %c0_5] : memref<16x64xbf16, #tpu.memory_space<vmem>>, vector<16x64xbf16>
    %c0_6 = arith.constant 0 : index
    %c0_7 = arith.constant 0 : index
    %5 = vector.load %arg7[%c0_6, %c0_7] : memref<64x128xbf16, #tpu.memory_space<vmem>>, vector<64x128xbf16>
    %cst_8 = arith.constant dense<0.000000e+00> : vector<16x128xf32>
    %6 = tpu.matmul %4, %5, %cst_8 {dimension_numbers = #tpu.dot_dimension_numbers<[1], [0], [0], [1], [0, 0, 1, 1], [], []>} : vector<16x64xbf16>, vector<64x128xbf16>, vector<16x128xf32> -> vector<16x128xf32>
    %7 = arith.addf %3, %6 : vector<16x128xf32>
    %8 = vector.shape_cast %7 : vector<16x128xf32> to vector<2x8x128xf32>
    %c0_9 = arith.constant 0 : index
    %c0_10 = arith.constant 0 : index
    %9 = vector.load %arg1[%c0_9, %c0_10] : memref<2x128xf32, #tpu.memory_space<vmem>>, vector<2x128xf32>
    %10 = vector.shape_cast %9 : vector<2x128xf32> to vector<2x1x128xf32>
    %11 = vector.broadcast %10 : vector<2x1x128xf32> to vector<2x8x128xf32>
    %12 = arith.addf %8, %11 : vector<2x8x128xf32>
    %13 = math.tanh %12 : vector<2x8x128xf32>
    %c0_11 = arith.constant 0 : index
    %c0_12 = arith.constant 0 : index
    %14 = vector.load %arg8[%c0_11, %c0_12] : memref<1x128xf32, #tpu.memory_space<vmem>>, vector<1x128xf32>
    %15 = vector.shape_cast %14 : vector<1x128xf32> to vector<1x1x128xf32>
    %16 = vector.broadcast %15 : vector<1x1x128xf32> to vector<2x8x128xf32>
    %17 = arith.mulf %13, %16 : vector<2x8x128xf32>
    %cst_13 = arith.constant dense<0.000000e+00> : vector<2x8xf32>
    %18 = vector.multi_reduction <add>, %17, %cst_13 [2] : vector<2x8x128xf32> to vector<2x8xf32>
    %c0_14 = arith.constant 0 : index
    %c0_15 = arith.constant 0 : index
    %19 = vector.load %arg5[%c0_14, %c0_15] : memref<2x8xf32, #tpu.memory_space<vmem>>, vector<2x8xf32>
    %cst_16 = arith.constant 0.000000e+00 : f32
    %20 = vector.broadcast %cst_16 : f32 to vector<2x8xf32>
    %21 = arith.cmpf ogt, %19, %20 : vector<2x8xf32>
    %cst_17 = arith.constant 0xFF800000 : f32
    %22 = vector.broadcast %cst_17 : f32 to vector<2x8xf32>
    %23 = arith.select %21, %22, %18 : vector<2x8xi1>, vector<2x8xf32>
    %cst_18 = arith.constant dense<0xFF800000> : vector<2xf32>
    %24 = vector.multi_reduction <maximumf>, %23, %cst_18 [1] : vector<2x8xf32> to vector<2xf32>
    %25 = vector.shape_cast %24 : vector<2xf32> to vector<2x1xf32>
    %26 = vector.broadcast %25 : vector<2x1xf32> to vector<2x8xf32>
    %27 = arith.subf %23, %26 : vector<2x8xf32>
    %28 = math.exp %27 : vector<2x8xf32>
    %cst_19 = arith.constant dense<0.000000e+00> : vector<2xf32>
    %29 = vector.multi_reduction <add>, %28, %cst_19 [1] : vector<2x8xf32> to vector<2xf32>
    %30 = vector.shape_cast %29 : vector<2xf32> to vector<2x1xf32>
    %31 = vector.broadcast %30 : vector<2x1xf32> to vector<2x8xf32>
    %32 = arith.divf %28, %31 : vector<2x8xf32>
    %33 = vector.shape_cast %32 : vector<2x8xf32> to vector<2x1x8xf32>
    %34 = arith.truncf %33 : vector<2x1x8xf32> to vector<2x1x8xbf16>
    "tpu.trace_start"() <{level = 10 : i32, message = "bqt,bte->bqe"}> : () -> ()
    %cst_20 = arith.constant dense<0.000000e+00> : vector<2x1x32xf32>
    %35 = tpu.matmul %34, %0, %cst_20 {dimension_numbers = #tpu.dot_dimension_numbers<[2], [1], [1], [2], [0, 0, 0, 1, 1, 2], [0], [0]>} : vector<2x1x8xbf16>, vector<2x8x32xbf16>, vector<2x1x32xf32> -> vector<2x1x32xf32>
    "tpu.trace_stop"() : () -> ()
    %36 = vector.shape_cast %35 : vector<2x1x32xf32> to vector<2x32xf32>
    %c0_21 = arith.constant 0 : index
    %c0_22 = arith.constant 0 : index
    %37 = vector.load %arg9[%c0_21, %c0_22] : memref<2x32xf32, #tpu.memory_space<vmem>>, vector<2x32xf32>
    tpu.vector_store %arg9[%c0_21, %c0_22], %36 {strides = array<i32>} : memref<2x32xf32, #tpu.memory_space<vmem>>, vector<2x32xf32>,
    %c0_23 = arith.constant 0 : index
    %c0_24 = arith.constant 0 : index
    %38 = vector.load %arg10[%c0_23, %c0_24] : memref<2x8xf32, #tpu.memory_space<vmem>>, vector<2x8xf32>
    tpu.vector_store %arg10[%c0_23, %c0_24], %32 {strides = array<i32>} : memref<2x8xf32, #tpu.memory_space<vmem>>, vector<2x8xf32>,
    %c0_25 = arith.constant 0 : index
    %c0_26 = arith.constant 0 : index
    %39 = vector.load %arg4[%c0_25, %c0_26] : memref<2x8xf32, #tpu.memory_space<vmem>>, vector<2x8xf32>
    %40 = arith.addf %39, %32 : vector<2x8xf32>
    %c0_27 = arith.constant 0 : index
    %c0_28 = arith.constant 0 : index
    %41 = vector.load %arg11[%c0_27, %c0_28] : memref<2x8xf32, #tpu.memory_space<vmem>>, vector<2x8xf32>
    tpu.vector_store %arg11[%c0_27, %c0_28], %40 {strides = array<i32>} : memref<2x8xf32, #tpu.memory_space<vmem>>, vector<2x8xf32>,
    return
  }
  func.func @transform_0(%arg0: i32) -> (i32, i32) {
    %c0_i32 = arith.constant 0 : i32
    %c0_i32_0 = arith.constant 0 : i32
    return %arg0, %c0_i32 : i32, i32
  }
  func.func @transform_1(%arg0: i32) -> (i32, i32, i32) {
    %c0_i32 = arith.constant 0 : i32
    %c0_i32_0 = arith.constant 0 : i32
    %c0_i32_1 = arith.constant 0 : i32
    return %arg0, %c0_i32, %c0_i32_0 : i32, i32, i32
  }
  func.func @transform_2(%arg0: i32) -> (i32, i32) {
    %c0_i32 = arith.constant 0 : i32
    %c0_i32_0 = arith.constant 0 : i32
    return %arg0, %c0_i32 : i32, i32
  }
  func.func @transform_3(%arg0: i32) -> (i32, i32) {
    %c0_i32 = arith.constant 0 : i32
    %c0_i32_0 = arith.constant 0 : i32
    return %arg0, %c0_i32 : i32, i32
  }
  func.func @transform_4(%arg0: i32) -> (i32, i32) {
    %c0_i32 = arith.constant 0 : i32
    %c0_i32_0 = arith.constant 0 : i32
    return %arg0, %c0_i32 : i32, i32
  }
  func.func @transform_5(%arg0: i32) -> (i32, i32) {
    %c0_i32 = arith.constant 0 : i32
    %c0_i32_0 = arith.constant 0 : i32
    %c0_i32_1 = arith.constant 0 : i32
    return %c0_i32, %c0_i32_0 : i32, i32
  }
  func.func @transform_6(%arg0: i32) -> (i32, i32) {
    %c0_i32 = arith.constant 0 : i32
    %c0_i32_0 = arith.constant 0 : i32
    %c0_i32_1 = arith.constant 0 : i32
    return %c0_i32, %c0_i32_0 : i32, i32
  }
  func.func @transform_7(%arg0: i32) -> (i32, i32) {
    %c0_i32 = arith.constant 0 : i32
    %c0_i32_0 = arith.constant 0 : i32
    %c0_i32_1 = arith.constant 0 : i32
    return %c0_i32, %c0_i32_0 : i32, i32
  }
  func.func @transform_8(%arg0: i32) -> (i32, i32) {
    %c0_i32 = arith.constant 0 : i32
    %c0_i32_0 = arith.constant 0 : i32
    return %arg0, %c0_i32 : i32, i32
  }
  func.func @transform_9(%arg0: i32) -> (i32, i32) {
    %c0_i32 = arith.constant 0 : i32
    %c0_i32_0 = arith.constant 0 : i32
    return %arg0, %c0_i32 : i32, i32
  }
  func.func @transform_10(%arg0: i32) -> (i32, i32) {
    %c0_i32 = arith.constant 0 : i32
    %c0_i32_0 = arith.constant 0 : i32
    return %arg0, %c0_i32 : i32, i32
  }
}

</mosaic_0001>

<bundles_post_ra>
// kernel: tpu_custom_call.1
= control target key start
LH: loop header
LB: loop body
LE: loop exit
PB: predicated region body
PF: predicated region fallthrough
CT: control target
= control target key end

     0   :  { %16 = vsyncpa [#allocation3], 0  ;;  %s991_s0 = inlined_call_operand.hbm [shape: f32[2,128], index: 0, kind: input, shape index: {}]   ;;  %s992_s1 = inlined_call_operand.hbm [shape: bf16[2,8,32], index: 1, kind: input, shape index: {}]   ;;  %s993_s2 = inlined_call_operand.hbm [shape: bf16[16,64], index: 2, kind: input, shape index: {}]   ;;  %s994_s3 = inlined_call_operand.vmem [shape: f32[2,8], index: 3, kind: input, shape index: {}]   ;;  %s995_s4 = inlined_call_operand.hbm [shape: f32[2,8], index: 4, kind: input, shape index: {}]   ;;  %s996_s5 = inlined_call_operand.vmem [shape: bf16[32,128], index: 5, kind: input, shape index: {}]   ;;  %s997_s6 = inlined_call_operand.hbm [shape: bf16[64,128], index: 6, kind: input, shape index: {}]   ;;  %s998_s7 = inlined_call_operand.vmem [shape: f32[1,128], index: 7, kind: input, shape index: {}]   ;;  %s999_s8 = inlined_call_operand.hbm [shape: f32[2,32], index: 8, kind: output, shape index: {0}]   ;;  %s1000_s9 = inlined_call_operand.hbm [shape: f32[2,8], index: 9, kind: output, shape index: {1}]   ;;  %s1001_s10 = inlined_call_operand.hbm [shape: f32[2,8], index: 10, kind: output, shape index: {2}]  }
   0x1   :  { %17 = vsyncpa [#allocation6], 0 }
   0x2   :  { %18 = vsyncpa [#allocation9], 0 }
   0x3   :  { %19 = vsyncpa [#allocation4], 0 }
   0x4   :  { %20 = vsyncpa [#allocation13], 0  ;;  %s781_s13 = smov [#allocation5]   ;;  %s595_s17 = scalar_lea.hbm %s992_s1, 128 }
   0x5   :  { %s36_s14 = sshll.u32 %s781_s13, 4  ;;  %p596_p0 = scmp.ne.s32.totalorder %s992_s1, %s595_s17  ;;  %s37_s14 = int_to_ptr.vmem [resolvable:$true] %s36_s14 }
   0x6   :  { %p599_p1 = scmp.lt.u32.totalorder %s595_s17, %s992_s1 }
   0x8   :  { %p601_p2 = pnand %p599_p1, %p596_p0 }
   0xa   :  { %604 = shalt.err (!%p601_p2)
}
   0xb   :  { %s605_s22 = scalar_lea.vmem %s37_s14, 128  ;;  %p610_p4 = scmp.lt.s32.totalorder %s37_s14, %s37_s14 }
   0xc   :  { %p606_p3 = scmp.ne.s32.totalorder %s37_s14, %s605_s22  ;;  %p611_p5 = scmp.lt.s32.totalorder %s605_s22, %s605_s22 }
   0xe   :  { %p612_p6 = por %p611_p5, %p610_p4 }
  0x10   :  { %p613_p7 = pnand %p612_p6, %p606_p3 }
  0x12   :  { %616 = shalt.err (!%p613_p7)
}
  0x13   :  { %s782_s23 = smov 64   ;;  %s783_s24 = smov 4  }
  0x14   :  { %42 = dma.hbm_to_vmem [thread:$0]  %s992_s1, 128, %s37_s14, [#allocation6], %s782_s23, %s782_s23, %s783_s24  }
  0x15   :  { %s784_s27 = smov [#allocation8]   ;;  %s785_s29 = smov [#allocation2]  }
  0x16   :  { %s63_s28 = sshll.u32 %s784_s27, 4  ;;  %s27_s30 = sshll.u32 %s785_s29, 4  ;;  %s64_s28 = int_to_ptr.vmem [resolvable:$true] %s63_s28  ;;  %s28_s30 = int_to_ptr.vmem [resolvable:$true] %s27_s30 }
  0x17   :  { %s617_s13 = scalar_lea.hbm %s995_s4, 32 }
  0x18   :  { %p618_p8 = scmp.ne.s32.totalorder %s995_s4, %s617_s13  ;;  %p621_p9 = scmp.lt.u32.totalorder %s617_s13, %s995_s4 }
  0x1a   :  { %p623_p10 = pnand %p621_p9, %p618_p8 }
  0x1c   :  { %626 = shalt.err (!%p623_p10)
}
  0x1d   :  { %s627_s1 = scalar_lea.vmem %s64_s28, 32  ;;  %p632_p12 = scmp.lt.s32.totalorder %s64_s28, %s64_s28 }
  0x1e   :  { %p628_p11 = scmp.ne.s32.totalorder %s64_s28, %s627_s1  ;;  %p633_p13 = scmp.lt.s32.totalorder %s627_s1, %s627_s1 }
  0x20   :  { %p634_p0 = por %p633_p13, %p632_p12 }
  0x22   :  { %p635_p1 = pnand %p634_p0, %p628_p11 }
  0x24   :  { %638 = shalt.err (!%p635_p1)
}
  0x25   :  { %66 = dma.hbm_to_vmem [thread:$0]  %s995_s4, 32, %s64_s28, [#allocation9]  }
  0x26   :  { %s639_s22 = scalar_lea.hbm %s991_s0, 32 }
  0x27   :  { %p640_p2 = scmp.ne.s32.totalorder %s991_s0, %s639_s22  ;;  %p643_p3 = scmp.lt.u32.totalorder %s639_s22, %s991_s0 }
  0x29   :  { %p645_p4 = pnand %p643_p3, %p640_p2 }
  0x2b   :  { %648 = shalt.err (!%p645_p4)
}
  0x2c   :  { %s649_s11 = scalar_lea.vmem %s28_s30, 32  ;;  %p654_p6 = scmp.lt.s32.totalorder %s28_s30, %s28_s30 }
  0x2d   :  { %p650_p5 = scmp.ne.s32.totalorder %s28_s30, %s649_s11  ;;  %p655_p7 = scmp.lt.s32.totalorder %s649_s11, %s649_s11 }
  0x2f   :  { %p656_p8 = por %p655_p7, %p654_p6 }
  0x31   :  { %p657_p9 = pnand %p656_p8, %p650_p5 }
  0x33   :  { %660 = shalt.err (!%p657_p9)
}
  0x34   :  { %30 = dma.hbm_to_vmem [thread:$0]  %s991_s0, 32, %s28_s30, [#allocation3]  }
  0x35   :  { %s786_s12 = smov [#allocation7]   ;;  %s787_s15 = smov [#allocation10]  }
  0x36   :  { %s48_s13 = sshll.u32 %s786_s12, 4  ;;  %s74_s16 = sshll.u32 %s787_s15, 4  ;;  %s49_s13 = int_to_ptr.vmem [resolvable:$true] %s48_s13  ;;  %s75_s16 = int_to_ptr.vmem [resolvable:$true] %s74_s16 }
  0x37   :  { %s661_s1 = scalar_lea.hbm %s993_s2, 128 }
  0x38   :  { %p662_p10 = scmp.ne.s32.totalorder %s993_s2, %s661_s1  ;;  %p665_p11 = scmp.lt.u32.totalorder %s661_s1, %s993_s2 }
  0x3a   :  { %p667_p12 = pnand %p665_p11, %p662_p10 }
  0x3c   :  { %670 = shalt.err (!%p667_p12)
}
  0x3d   :  { %s671_s0 = scalar_lea.vmem %s49_s13, 128  ;;  %p676_p0 = scmp.lt.s32.totalorder %s49_s13, %s49_s13 }
  0x3e   :  { %p672_p13 = scmp.ne.s32.totalorder %s49_s13, %s671_s0  ;;  %p677_p1 = scmp.lt.s32.totalorder %s671_s0, %s671_s0 }
  0x40   :  { %p678_p2 = por %p677_p1, %p676_p0 }
  0x42   :  { %p679_p3 = pnand %p678_p2, %p672_p13 }
  0x44   :  { %682 = shalt.err (!%p679_p3)
}
  0x45   :  { %54 = dma.hbm_to_vmem [thread:$0]  %s993_s2, 128, %s49_s13, [#allocation6], %s782_s23, %s782_s23, %s783_s24  }
  0x46   :  { %s683_s27 = scalar_lea.hbm %s997_s6, 512 }
  0x47   :  { %p684_p4 = scmp.ne.s32.totalorder %s997_s6, %s683_s27  ;;  %p687_p5 = scmp.lt.u32.totalorder %s683_s27, %s997_s6 }
  0x49   :  { %p689_p6 = pnand %p687_p5, %p684_p4 }
  0x4b   :  { %692 = shalt.err (!%p689_p6)
}
  0x4c   :  { %s693_s12 = scalar_lea.vmem %s75_s16, 512  ;;  %p698_p8 = scmp.lt.s32.totalorder %s75_s16, %s75_s16 }
  0x4d   :  { %p694_p7 = scmp.ne.s32.totalorder %s75_s16, %s693_s12  ;;  %p699_p9 = scmp.lt.s32.totalorder %s693_s12, %s693_s12 }
  0x4f   :  { %p700_p10 = por %p699_p9, %p698_p8 }
  0x51   :  { %p701_p11 = pnand %p700_p10, %p694_p7 }
  0x53   :  { %704 = shalt.err (!%p701_p11)
}
  0x54   :  { %80 = dma.hbm_to_vmem [thread:$0]  %s997_s6, 512, %s75_s16, [#allocation9], %s782_s23, %s782_s23, %s783_s24  }
  0x55   :  { %771 = dma.done.wait [#allocation3], 32  }
  0x56   :  { %772 = vsyncadd [#allocation3], 4294967264 }
  0x57   :  { %773 = dma.done.wait [#allocation6], 256  }
  0x58   :  { %774 = vsyncadd [#allocation6], 4294967040 }
  0x59   :  { %775 = dma.done.wait [#allocation9], 544  }
  0x5a   :  { %776 = vsyncadd [#allocation9], 4294966752  ;;  %v788_v0 = vmov 0.0   ;;  %vm789_vm0 = vmmov 0   ;;  %v579_v1 = vld [vmem:[#allocation10] sm:$0xff]   ;;  %v580_v2 = vld [vmem:[#allocation10 + $0x8] sm:$0xff]   ;;  %v264_v11 = vlaneseq }
  0x5b   :  { %534 = vmatprep.subr.bf16.mxu0 %v788_v0  ;;  %546 = vmatprep.subr.bf16.mxu1 %v788_v0  ;;  %v581_v3 = vld [vmem:[%s996_s5] sm:$0xff]   ;;  %v583_v4 = vld [vmem:[%s996_s5 + $0x8] sm:$0xff]   ;;  %v582_v5 = vld [vmem:[#allocation10 + $0x10] sm:$0xff]   ;;  %vm206_vm1 = vcmask 261120   ;;  %vm144_vm2 = vcmask 523264   ;;  %vm316_vm3 = vcmask 1041409  }
  0x5c   :  { %550 = vmatprep.mubr.msk.bf16.mxu1 %vm789_vm0, %v788_v0  ;;  %542 = vmatprep.mubr.msk.bf16.mxu0 %vm789_vm0, %v788_v0  ;;  %v926_v6 = vld [vmem:[#allocation5] sm:$0xf]  ;;  %v928_v7 = vld [vmem:[#allocation5 + $0x4] sm:$0xf]  ;;  %v584_v9 = vld [vmem:[#allocation10 + $0x18] sm:$0xff]   ;;  %v265_v12 = vshrl.u32 %v264_v11, 7 }
  0x5d   :  { %535 = vmatpush3.bf16.msra.mxu0 %v579_v1  ;;  %547 = vmatpush3.bf16.msra.mxu1 %v581_v3  ;;  %v514_v8 = vcombine.low %v926_v6, %v928_v7  ;;  %v586_v10 = vld [vmem:[#allocation7] sm:$0xff]   ;;  %v307_v13 = vand.u32 127, %v264_v11  ;;  %v790_v15 = vmov 1966171168   ;;  %v302_v44 = vld [vmem:[#allocation8] sm:$0x3] }
  0x5e   :  { %536 = vmatprep.subr.bf16.mxu0 %v788_v0  ;;  %548 = vmatprep.subr.bf16.mxu1 %v788_v0  ;;  %v262_v16 = vunpack.c.l.s4 %v790_v15  ;;  %v518_v18 = vld.sshfl [vmem:[#allocation2] sm:$0x11 pattern:$0x75316420]  ;;  %v277_v24 = vsub.s32 0, %v265_v12  ;;  %vm303_vm4 = vcmp.gt.f32.partialorder %v302_v44, 0.0 }
  0x5f   :  { %v310_v14 = vsub.s32 %v307_v13, %v265_v12  ;;  %v260_v20 = vcombine.high %v518_v18, %v518_v18  ;;  %v519_v38 = vld [vmem:[%s998_s7] ss:$0 sm:$0xff]  ;;  %vm320_vm5 = vcmask 58368   ;;  %vm363_vm6 = vcmask 1043456   ;;  %s791_s18 = smov [#allocation12]  }
  0x60   :  { %v263_v17 = vunpack.c.0.s8 %v262_v16  ;;  %v411_v56 = vsel %vm363_vm6, %v928_v7, 0  ;;  %v365_v57 = vsel %vm363_vm6, %v926_v6, 0  ;;  %v461_v60 = vld [vmem:[%s994_s3] sm:$0x3]  ;;  %vm359_vm7 = vcmask 64512   ;;  %s480_s3 = sshll.u32 %s791_s18, 4  ;;  %s481_s3 = int_to_ptr.vmem [resolvable:$true] %s480_s3 }
  0x61   :  { %537 = vmatpush3.bf16.msra.mxu0 %v580_v2  ;;  %549 = vmatpush3.bf16.msra.mxu1 %v583_v4  ;;  %s705_s1 = scalar_lea.vmem %s481_s3, 32  ;;  %p710_p13 = scmp.lt.s32.totalorder %s481_s3, %s481_s3 }
  0x62   :  { %538 = vmatprep.subr.bf16.mxu0 %v788_v0  ;;  %554 = vmatprep.subr.bf16.mxu1 %v788_v0  ;;  %v934_v19 = vsub.s32 %v263_v17, %v265_v12  ;;  %p706_p12 = scmp.ne.s32.totalorder %s481_s3, %s705_s1  ;;  %p711_p0 = scmp.lt.s32.totalorder %s705_s1, %s705_s1 }
  0x64   :  { %551 = vmatmul.mubr.msk.bf16.vlgmr.msra.gmra.mrb[0].mxu1 %vm206_vm1, %v514_v8  ;;  %v267_v23 = vrot.slane %v518_v18, %v934_v19  ;;  %v274_v27 = vrot.slane %v260_v20, %v934_v19  ;;  %p712_p1 = por %p711_p0, %p710_p13 }
  0x65   :  { %539 = vmatpush3.bf16.msra.mxu0 %v582_v5  ;;  %556 = vmatprep.mubr.msk.bf16.mxu1 %vm789_vm0, %v788_v0 }
  0x66   :  { %540 = vmatprep.subr.bf16.mxu0 %v788_v0  ;;  %v278_v28 = vrot.slane %v267_v23, %v277_v24  ;;  %v282_v32 = vrot.slane %v274_v27, %v277_v24  ;;  %555 = vmatpush3.bf16.msra.mxu1 %v365_v57  ;;  %p713_p2 = pnand %p712_p1, %p706_p12 }
  0x69   :  { %541 = vmatpush3.bf16.msra.mxu0 %v584_v9 }
  0x6a   :  { %560 = vmatprep.subr.bf16.mxu0 %v788_v0 }
  0x6c   :  { %543 = vmatmul.mubr.msk.bf16.vlgmr.msra.gmra.mrb[0].mxu0 %vm144_vm2, %v586_v10 }
  0x6d   :  { %562 = vmatprep.mubr.msk.bf16.mxu0 %vm789_vm0, %v788_v0  ;;  %561 = vmatpush3.bf16.msra.mxu0 %v411_v56 }
 0x137   :  { %v244_v21 = vpop.f32.mrb[0].mxu1 }
 0x138   :  { %v552_v22 = vpop.f32.mrb[1].mxu1 }
 0x139   :  { %v247_v25 = vpop.f32.mrb[2].mxu1 }
 0x13a   :  { %v553_v26 = vpop.f32.mrb[3].mxu1 }
 0x13f   :  { %v182_v29 = vpop.f32.mrb[0].mxu0 }
 0x140   :  { %v245_v30 = vadd.f32 %v244_v21, %v182_v29  ;;  %v544_v31 = vpop.f32.mrb[1].mxu0 }
 0x141   :  { %v185_v33 = vpop.f32.mrb[2].mxu0 }
 0x142   :  { %v285_v34 = vadd.f32 %v278_v28, %v245_v30  ;;  %v248_v35 = vadd.f32 %v247_v25, %v185_v33  ;;  %v545_v36 = vpop.f32.mrb[3].mxu0 }
 0x144   :  { %587 = vtanh.f32 %v285_v34  ;;  %v286_v37 = vadd.f32 %v282_v32, %v248_v35 }
 0x146   :  { %589 = vtanh.f32 %v286_v37 }
 0x14e   :  { %v588_v39 = vpop.eup %587 }
 0x14f   :  { %v296_v40 = vmul.f32 %v588_v39, %v519_v38 }
 0x150   :  { %v590_v41 = vpop.eup %589 }
 0x151   :  { %298 = vadd.xlane.f32.xlu0 %v296_v40  ;;  %v297_v42 = vmul.f32 %v590_v41, %v519_v38 }
 0x155   :  { %300 = vadd.xlane.f32.xlu0 %v297_v42 }
 0x1de   :  { %v299_v43 = vpop.xlane.xlu0 %298 }
 0x1df   :  { %v311_v46 = vrot.slane %v299_v43, %v310_v14 }
 0x1e2   :  { %v301_v45 = vpop.xlane.xlu0 %300 }
 0x1e3   :  { %v315_v47 = vrot.slane %v301_v45, %v310_v14 }
 0x1e5   :  { %v317_v48 = vsel %vm316_vm3, %v315_v47, %v311_v46 }
 0x1e6   :  { %v319_v49 = vsel %vm303_vm4, -inf, %v317_v48 }
 0x1e7   :  { %v321_v50 = vsel %vm320_vm5, %v319_v49, -inf }
 0x1e8   :  { %322 = vmax.xlane.f32.xlu1 %v321_v50 }
 0x275   :  { %v323_v51 = vpop.xlane.xlu1 %322 }
 0x276   :  { %v324_v52 = vsub.f32 %v319_v49, %v323_v51 }
 0x278   :  { %v325_v53 = vmul.f32 1.442695, %v324_v52 }
 0x27a   :  { %591 = vpow2.f32 %v325_v53 }
 0x284   :  { %v592_v54 = vpop.eup %591 }
 0x285   :  { %v327_v55 = vsel %vm320_vm5, %v592_v54, 0.0 }
 0x286   :  { %328 = vadd.xlane.f32.xlu1 %v327_v55 }
 0x313   :  { %v329_v58 = vpop.xlane.xlu1 %328 }
 0x314   :  { %593 = vrcp.f32 %v329_v58 }
 0x31e   :  { %v594_v59 = vpop.eup %593 }
 0x31f   :  { %v331_v61 = vmul.f32 %v594_v59, %v592_v54 }
 0x321   :  { %460 = vst.msk [vmem:[#allocation12] sm:$0x3] %vm320_vm5, %v331_v61  ;;  %v339_v62 = vrot.slane %v331_v61, %v934_v19  ;;  %v462_v63 = vadd.f32 %v461_v60, %v331_v61 }
 0x323   :  { %v347_v0 = vrot.slane %v339_v62, %v934_v19  ;;  %v340_v1 = vcombine.high %v339_v62, %v339_v62  ;;  %463 = vst.msk [vmem:[#allocation14] sm:$0x3] %vm320_vm5, %v462_v63 }
 0x325   :  { %v357_v2 = vpack.c.bf16 %v347_v0, %v347_v0  ;;  %v354_v3 = vrot.slane %v340_v1, %v934_v19 }
 0x327   :  { %557 = vmatmul.mubr.msk.bf16.vlgmr.msra.gmra.mrb[4].mxu1 %vm359_vm7, %v357_v2  ;;  %v358_v4 = vpack.c.bf16 %v354_v3, %v354_v3 }
 0x329   :  { %563 = vmatmul.mubr.msk.bf16.vlgmr.msra.gmra.mrb[4].mxu0 %vm359_vm7, %v358_v4 }
 0x32a   :  { %716 = shalt.err (!%p713_p2)
}
 0x32b   :  { %s717_s20 = scalar_lea.hbm %s1000_s9, 32 }
 0x32c   :  { %p718_p3 = scmp.ne.s32.totalorder %s1000_s9, %s717_s20  ;;  %p721_p4 = scmp.lt.u32.totalorder %s717_s20, %s1000_s9 }
 0x32e   :  { %p723_p5 = pnand %p721_p4, %p718_p3 }
 0x330   :  { %726 = shalt.err (!%p723_p5)
}
 0x331   :  { %483 = dma.vmem_to_hbm [thread:$0]  %s481_s3, 32, %s1000_s9, [#allocation13]  }
 0x332   :  { %s792_s27 = smov [#allocation14]  }
 0x333   :  { %s490_s29 = sshll.u32 %s792_s27, 4  ;;  %s491_s29 = int_to_ptr.vmem [resolvable:$true] %s490_s29 }
 0x334   :  { %s727_s11 = scalar_lea.vmem %s491_s29, 32  ;;  %p732_p7 = scmp.lt.s32.totalorder %s491_s29, %s491_s29 }
 0x335   :  { %p728_p6 = scmp.ne.s32.totalorder %s491_s29, %s727_s11  ;;  %p733_p8 = scmp.lt.s32.totalorder %s727_s11, %s727_s11 }
 0x337   :  { %p734_p9 = por %p733_p8, %p732_p7 }
 0x339   :  { %p735_p10 = pnand %p734_p9, %p728_p6 }
 0x33b   :  { %738 = shalt.err (!%p735_p10)
}
 0x33c   :  { %s739_s12 = scalar_lea.hbm %s1001_s10, 32 }
 0x33d   :  { %p740_p11 = scmp.ne.s32.totalorder %s1001_s10, %s739_s12  ;;  %p743_p12 = scmp.lt.u32.totalorder %s739_s12, %s1001_s10 }
 0x33f   :  { %p745_p13 = pnand %p743_p12, %p740_p11 }
 0x341   :  { %748 = shalt.err (!%p745_p13)
}
 0x342   :  { %493 = dma.vmem_to_hbm [thread:$0]  %s491_s29, 32, %s1001_s10, [#allocation13]   ;;  %vm458_vm8 = vcmask 254976  }
 0x343   :  { %s793_s23 = smov [#allocation11]  }
 0x344   :  { %s470_s5 = sshll.u32 %s793_s23, 4  ;;  %s471_s5 = int_to_ptr.vmem [resolvable:$true] %s470_s5 }
 0x345   :  { %s749_s24 = scalar_lea.vmem %s471_s5, 32  ;;  %p754_p1 = scmp.lt.s32.totalorder %s471_s5, %s471_s5 }
 0x346   :  { %p750_p0 = scmp.ne.s32.totalorder %s471_s5, %s749_s24  ;;  %p755_p2 = scmp.lt.s32.totalorder %s749_s24, %s749_s24 }
 0x348   :  { %p756_p3 = por %p755_p2, %p754_p1 }
 0x34a   :  { %p757_p4 = pnand %p756_p3, %p750_p0 }
 0x3fa   :  { %v401_v5 = vpop.f32.mrb[4].mxu1 }
 0x3fb   :  { %v558_v6 = vpop.f32.mrb[5].mxu1 }
 0x3fc   :  { %v404_v7 = vpop.f32.mrb[6].mxu1  ;;  %v447_v8 = vpop.f32.mrb[4].mxu0 }
 0x3fd   :  { %v455_v9 = vrot.slane %v447_v8, 7  ;;  %v559_v10 = vpop.f32.mrb[7].mxu1  ;;  %v564_v11 = vpop.f32.mrb[5].mxu0 }
 0x3fe   :  { %v450_v12 = vpop.f32.mrb[6].mxu0 }
 0x3ff   :  { %v565_v13 = vpop.f32.mrb[7].mxu0  ;;  %v456_v14 = vsel %vm316_vm3, %v455_v9, %v401_v5 }
 0x400   :  { %459 = vst.msk [vmem:[#allocation11] sm:$0x3] %vm458_vm8, %v456_v14 }
 0x401   :  { %760 = shalt.err (!%p757_p4)
}
 0x402   :  { %s761_s16 = scalar_lea.hbm %s999_s8, 32 }
 0x403   :  { %p762_p5 = scmp.ne.s32.totalorder %s999_s8, %s761_s16  ;;  %p765_p6 = scmp.lt.u32.totalorder %s761_s16, %s999_s8 }
 0x405   :  { %p767_p7 = pnand %p765_p6, %p762_p5 }
 0x407   :  { %770 = shalt.err (!%p767_p7)
}
 0x408   :  { %473 = dma.vmem_to_hbm [thread:$0]  %s471_s5, 32, %s999_s8, [#allocation4]  }
 0x409   :  { %777 = dma.done.wait [#allocation4], 32  }
 0x40a   :  { %778 = vsyncadd [#allocation4], 4294967264 }
 0x40b   :  { %779 = dma.done.wait [#allocation13], 64  }
 0x40c   :  { %780 = vsyncadd [#allocation13], 4294967232 }
 0x40d   :  { %503 = vsyncpa [#allocation3], 1 }
 0x40e   :  { %504 = vsyncpa [#allocation6], 1 }
 0x40f   :  { %505 = vsyncpa [#allocation9], 1 }
 0x410   :  { %506 = vsyncpa [#allocation4], 1 }
 0x411   :  { %507 = vsyncpa [#allocation13], 1 }

</bundles_post_ra>
